<compile_context>
chip_gen: v6e
topology: v6e:2x2x1
jax: 0.10.0
libtpu: 0.0.40
codegen_flags: <defaults>
</compile_context>

<pallas_src>
import functools

import jax
import jax.numpy as jnp
from jax.experimental import pallas as pl
from jax.experimental.pallas import tpu as pltpu

HIDDEN = 16  # fixed by the module definition


def _round_up(n, m):
    return ((n + m - 1) // m) * m


def pack_params(params, state_dim, action_dim, ad_pad):
    """Pack w1,b1,w2,b2,w3,b3 into one (rows, 128k) f32 slab (single DMA).

    Layout (PyTorch (out, in) weight layout, biases stored as a column right
    after the weight block):
      rows  0:16          cols 0:state_dim -> w1 ; col state_dim -> b1
      rows 16:32          cols 0:16        -> w2 ; col 16        -> b2
      rows 32:32+act_dim  cols 0:16        -> w3 ; col 16        -> b3
    Remaining entries are zero (padded fc3 rows produce 1 + 0.1*tanh(0) and
    are sliced off in the wrapper).
    """
    rows = 2 * HIDDEN + ad_pad
    cols = _round_up(max(state_dim, HIDDEN) + 1, 128)
    slab = jnp.zeros((rows, cols), jnp.float32)
    slab = slab.at[0:HIDDEN, 0:state_dim].set(params["w1"])
    slab = slab.at[0:HIDDEN, state_dim].set(params["b1"])
    slab = slab.at[HIDDEN:2 * HIDDEN, 0:HIDDEN].set(params["w2"])
    slab = slab.at[HIDDEN:2 * HIDDEN, HIDDEN].set(params["b2"])
    slab = slab.at[2 * HIDDEN:2 * HIDDEN + action_dim, 0:HIDDEN].set(params["w3"])
    slab = slab.at[2 * HIDDEN:2 * HIDDEN + action_dim, HIDDEN].set(params["b3"])
    return slab


def _actor_kernel(slab_ref, xt_ref, ot_ref, *, state_dim, ad_pad):
    """One batch tile, features-major: all tensors are (features, TB)."""
    x = xt_ref[...]  # (state_dim, TB), batch on the lane axis

    # fc1 + relu
    w1 = slab_ref[0:HIDDEN, 0:state_dim]                      # (16, state_dim)
    b1 = slab_ref[0:HIDDEN, state_dim:state_dim + 1]          # (16, 1)
    h = jnp.dot(w1, x, preferred_element_type=jnp.float32) + b1
    h = jnp.maximum(h, 0.0)                                    # (16, TB)

    # fc2 + relu
    w2 = slab_ref[HIDDEN:2 * HIDDEN, 0:HIDDEN]                 # (16, 16)
    b2 = slab_ref[HIDDEN:2 * HIDDEN, HIDDEN:HIDDEN + 1]        # (16, 1)
    h = jnp.dot(w2, h, preferred_element_type=jnp.float32) + b2
    h = jnp.maximum(h, 0.0)                                    # (16, TB)

    # fc3 + tanh, then affine 1 + 0.1 * a   (rows padded to ad_pad)
    w3 = slab_ref[2 * HIDDEN:2 * HIDDEN + ad_pad, 0:HIDDEN]    # (ad_pad, 16)
    b3 = slab_ref[2 * HIDDEN:2 * HIDDEN + ad_pad, HIDDEN:HIDDEN + 1]
    h = jnp.dot(w3, h, preferred_element_type=jnp.float32) + b3
    ot_ref[...] = (1.0 + 0.1 * jnp.tanh(h)).astype(ot_ref.dtype)


def actor_forward(x, params, *, tb=None):
    """x: (B, state_dim) float32. params: PyTorch-layout w1,b1,w2,b2,w3,b3."""
    B, state_dim = x.shape
    action_dim = params["w3"].shape[0]
    ad_pad = max(8, _round_up(action_dim, 8))       # sublane-dense output rows

    slab = pack_params(params, state_dim, action_dim, ad_pad)

    # Batch tile: multiple of 128 (lane width). Feature dims are tiny, so a
    # large tile is needed to amortize per-step overhead; VMEM cost is small
    # ((state_dim + ad_pad) * tb * 4B * 2 buffers), well within v7x's 64 MiB.
    if tb is None:
        tb = min(2048, _round_up(B, 128))
    tb = max(128, _round_up(tb, 128))
    b_pad = _round_up(B, tb)

    # Features-major input: (state_dim, B_pad), batch on lanes.
    xt = jnp.pad(x.astype(jnp.float32).T, ((0, 0), (0, b_pad - B)))

    kernel = functools.partial(_actor_kernel, state_dim=state_dim, ad_pad=ad_pad)

    out_t = pl.pallas_call(
        kernel,
        out_shape=jax.ShapeDtypeStruct((ad_pad, b_pad), jnp.float32),
        grid=(b_pad // tb,),
        in_specs=[
            # Packed parameters: constant block index -> single DMA, resident.
            pl.BlockSpec(slab.shape, lambda i: (0, 0)),
            # Streaming activations: one batch tile per grid step.
            pl.BlockSpec((state_dim, tb), lambda i: (0, i)),
        ],
        out_specs=pl.BlockSpec((ad_pad, tb), lambda i: (0, i)),
        compiler_params=pltpu.CompilerParams(
            dimension_semantics=("parallel",),  # 2x on v7x's two TensorCores
        ),
    )(slab, xt)

    return out_t[:action_dim, :B].T  # back to (B, action_dim)


def init_params(key, state_dim, action_dim):
    """Deterministic synthetic init, PyTorch nn.Linear layout: W (out, in), b (out,)."""
    ks = jax.random.split(key, 6)

    def linear(kw, kb, fan_in, fan_out):
        bound = 1.0 / float(fan_in) ** 0.5
        w = jax.random.uniform(kw, (fan_out, fan_in), jnp.float32, -bound, bound)
        b = jax.random.uniform(kb, (fan_out,), jnp.float32, -bound, bound)
        return w, b

    w1, b1 = linear(ks[0], ks[1], state_dim, HIDDEN)
    w2, b2 = linear(ks[2], ks[3], HIDDEN, HIDDEN)
    w3, b3 = linear(ks[4], ks[5], HIDDEN, action_dim)
    return {"w1": w1, "b1": b1, "w2": w2, "b2": b2, "w3": w3, "b3": b3}


def actor_reference(x, p):
    """Pure-JAX reference for correctness check (matches the PyTorch module)."""
    a = jax.nn.relu(x @ p["w1"].T + p["b1"])
    a = jax.nn.relu(a @ p["w2"].T + p["b2"])
    a = jnp.tanh(a @ p["w3"].T + p["b3"])
    return 1.0 + 0.1 * a


if __name__ == "__main__":
    key = jax.random.PRNGKey(0)
    k_params, k_x_small, k_x_big = jax.random.split(key, 3)

    state_dim, action_dim = 8, 4
    params = init_params(k_params, state_dim, action_dim)

    # Case 1: small batch (single grid step, batch padded up to one 128 tile).
    x_small = jax.random.normal(k_x_small, (8, state_dim), jnp.float32)
    out_small = jax.block_until_ready(actor_forward(x_small, params))
    ref_small = actor_reference(x_small, params)
    assert out_small.shape == (8, action_dim)
    assert jnp.allclose(out_small, ref_small, atol=1e-5, rtol=1e-4), "small-batch mismatch"

    # Case 2: ragged batch with tb=128 -> exercises the multi-step grid (grid=3)
    # and the batch padding / un-padding path.
    x_big = jax.random.normal(k_x_big, (300, state_dim), jnp.float32)
    out_big = jax.block_until_ready(actor_forward(x_big, params, tb=128))
    ref_big = actor_reference(x_big, params)
    assert out_big.shape == (300, action_dim)
    assert jnp.allclose(out_big, ref_big, atol=1e-5, rtol=1e-4), "multi-tile mismatch"

    print("KERNEL_OK")
</pallas_src>

<mosaic_0001>
module attributes {stable_mosaic.version = 11 : i64} {
  func.func @_actor_kernel(%arg0: i32, %arg1: memref<40x128xf32, #tpu.memory_space<vmem>>, %arg2: memref<8x128xf32, #tpu.memory_space<vmem>>, %arg3: memref<8x128xf32, #tpu.memory_space<vmem>>) attributes {dimension_semantics = [#tpu.dimension_semantics<parallel>], iteration_bounds = array<i64: 1>, scalar_prefetch = 0 : i64, scratch_operands = 0 : i64, tpu.core_type = #tpu.core_type<tc>, window_params = [{pipeline_mode = #tpu.pipeline_mode<synchronous>, transform_indices = @transform_0, window_bounds = array<i64: 40, 128>}, {transform_indices = @transform_1, window_bounds = array<i64: 8, 128>}, {transform_indices = @transform_2, window_bounds = array<i64: 8, 128>}]} {
    %c0 = arith.constant 0 : index
    %c0_0 = arith.constant 0 : index
    %0 = vector.load %arg2[%c0, %c0_0] : memref<8x128xf32, #tpu.memory_space<vmem>>, vector<8x128xf32>
    %c0_1 = arith.constant 0 : index
    %c0_2 = arith.constant 0 : index
    %1 = vector.load %arg1[%c0_1, %c0_2] : memref<40x128xf32, #tpu.memory_space<vmem>>, vector<16x8xf32>
    %c0_3 = arith.constant 0 : index
    %c8 = arith.constant 8 : index
    %2 = vector.load %arg1[%c0_3, %c8] : memref<40x128xf32, #tpu.memory_space<vmem>>, vector<16x1xf32>
    %cst = arith.constant dense<0.000000e+00> : vector<16x128xf32>
    %3 = tpu.matmul %1, %0, %cst {dimension_numbers = #tpu.dot_dimension_numbers<[1], [0], [0], [1], [0, 0, 1, 1], [], []>} : vector<16x8xf32>, vector<8x128xf32>, vector<16x128xf32> -> vector<16x128xf32>
    %4 = vector.broadcast %2 : vector<16x1xf32> to vector<16x128xf32>
    %5 = arith.addf %3, %4 : vector<16x128xf32>
    %cst_4 = arith.constant 0.000000e+00 : f32
    %6 = vector.broadcast %cst_4 : f32 to vector<16x128xf32>
    %7 = arith.maximumf %5, %6 : vector<16x128xf32>
    %c16 = arith.constant 16 : index
    %c0_5 = arith.constant 0 : index
    %8 = vector.load %arg1[%c16, %c0_5] : memref<40x128xf32, #tpu.memory_space<vmem>>, vector<16x16xf32>
    %c16_6 = arith.constant 16 : index
    %c16_7 = arith.constant 16 : index
    %9 = vector.load %arg1[%c16_6, %c16_7] : memref<40x128xf32, #tpu.memory_space<vmem>>, vector<16x1xf32>
    %cst_8 = arith.constant dense<0.000000e+00> : vector<16x128xf32>
    %10 = tpu.matmul %8, %7, %cst_8 {dimension_numbers = #tpu.dot_dimension_numbers<[1], [0], [0], [1], [0, 0, 1, 1], [], []>} : vector<16x16xf32>, vector<16x128xf32>, vector<16x128xf32> -> vector<16x128xf32>
    %11 = vector.broadcast %9 : vector<16x1xf32> to vector<16x128xf32>
    %12 = arith.addf %10, %11 : vector<16x128xf32>
    %cst_9 = arith.constant 0.000000e+00 : f32
    %13 = vector.broadcast %cst_9 : f32 to vector<16x128xf32>
    %14 = arith.maximumf %12, %13 : vector<16x128xf32>
    %c32 = arith.constant 32 : index
    %c0_10 = arith.constant 0 : index
    %15 = vector.load %arg1[%c32, %c0_10] : memref<40x128xf32, #tpu.memory_space<vmem>>, vector<8x16xf32>
    %c32_11 = arith.constant 32 : index
    %c16_12 = arith.constant 16 : index
    %16 = vector.load %arg1[%c32_11, %c16_12] : memref<40x128xf32, #tpu.memory_space<vmem>>, vector<8x1xf32>
    %cst_13 = arith.constant dense<0.000000e+00> : vector<8x128xf32>
    %17 = tpu.matmul %15, %14, %cst_13 {dimension_numbers = #tpu.dot_dimension_numbers<[1], [0], [0], [1], [0, 0, 1, 1], [], []>} : vector<8x16xf32>, vector<16x128xf32>, vector<8x128xf32> -> vector<8x128xf32>
    %18 = vector.broadcast %16 : vector<8x1xf32> to vector<8x128xf32>
    %19 = arith.addf %17, %18 : vector<8x128xf32>
    %20 = math.tanh %19 : vector<8x128xf32>
    %cst_14 = arith.constant 1.000000e-01 : f32
    %21 = vector.broadcast %cst_14 : f32 to vector<8x128xf32>
    %22 = arith.mulf %21, %20 : vector<8x128xf32>
    %cst_15 = arith.constant 1.000000e+00 : f32
    %23 = vector.broadcast %cst_15 : f32 to vector<8x128xf32>
    %24 = arith.addf %23, %22 : vector<8x128xf32>
    %c0_16 = arith.constant 0 : index
    %c0_17 = arith.constant 0 : index
    %25 = vector.load %arg3[%c0_16, %c0_17] : memref<8x128xf32, #tpu.memory_space<vmem>>, vector<8x128xf32>
    tpu.vector_store %arg3[%c0_16, %c0_17], %24 {strides = array<i32>} : memref<8x128xf32, #tpu.memory_space<vmem>>, vector<8x128xf32>,
    return
  }
  func.func @transform_0(%arg0: i32) -> (i32, i32) {
    %c0_i32 = arith.constant 0 : i32
    %c0_i32_0 = arith.constant 0 : i32
    %c0_i32_1 = arith.constant 0 : i32
    return %c0_i32, %c0_i32_0 : i32, i32
  }
  func.func @transform_1(%arg0: i32) -> (i32, i32) {
    %c0_i32 = arith.constant 0 : i32
    %c0_i32_0 = arith.constant 0 : i32
    return %c0_i32, %arg0 : i32, i32
  }
  func.func @transform_2(%arg0: i32) -> (i32, i32) {
    %c0_i32 = arith.constant 0 : i32
    %c0_i32_0 = arith.constant 0 : i32
    return %c0_i32, %arg0 : i32, i32
  }
}

</mosaic_0001>

<bundles_post_ra>
// kernel: tpu_custom_call.1
= control target key start
LH: loop header
LB: loop body
LE: loop exit
PB: predicated region body
PF: predicated region fallthrough
CT: control target
= control target key end

     0   :  { %7 = vsyncpa [#allocation3], 0  ;;  %s475_s0 = inlined_call_operand.hbm [shape: f32[40,128], index: 0, kind: input, shape index: {}]   ;;  %s476_s1 = inlined_call_operand.hbm [shape: f32[8,128], index: 1, kind: input, shape index: {}]   ;;  %s477_s2 = inlined_call_operand.hbm [shape: f32[8,128], index: 2, kind: output, shape index: {}]  }
   0x1   :  { %8 = vsyncpa [#allocation6], 0 }
   0x2   :  { %9 = vsyncpa [#allocation4], 0  ;;  %s439_s9 = smov [#allocation2]  }
   0x3   :  { %s15_s10 = sshll.u32 %s439_s9, 4  ;;  %s16_s10 = int_to_ptr.vmem [resolvable:$true] %s15_s10 }
   0x4   :  { %s381_s11 = scalar_lea.vmem %s16_s10, 640  ;;  %p386_p1 = scmp.lt.s32.totalorder %s16_s10, %s16_s10 }
   0x5   :  { %p382_p0 = scmp.ne.s32.totalorder %s16_s10, %s381_s11  ;;  %p387_p2 = scmp.lt.s32.totalorder %s381_s11, %s381_s11 }
   0x7   :  { %p388_p3 = por %p387_p2, %p386_p1 }
   0x9   :  { %p389_p4 = pnand %p388_p3, %p382_p0 }
   0xb   :  { %392 = shalt.err (!%p389_p4)
}
   0xc   :  { %s440_s12 = smov 128   ;;  %s441_s13 = smov 8  }
   0xd   :  { %21 = dma.hbm_to_vmem [thread:$0]  %s475_s0, 640, %s16_s10, [#allocation3], %s440_s12, %s440_s12, %s441_s13  }
   0xe   :  { %s442_s16 = smov [#allocation5]  }
   0xf   :  { %s28_s17 = sshll.u32 %s442_s16, 4  ;;  %s29_s17 = int_to_ptr.vmem [resolvable:$true] %s28_s17 }
  0x10   :  { %s401_s18 = scalar_lea.vmem %s29_s17, 128  ;;  %p406_p6 = scmp.lt.s32.totalorder %s29_s17, %s29_s17 }
  0x11   :  { %p402_p5 = scmp.ne.s32.totalorder %s29_s17, %s401_s18  ;;  %p407_p7 = scmp.lt.s32.totalorder %s401_s18, %s401_s18 }
  0x13   :  { %p408_p8 = por %p407_p7, %p406_p6 }
  0x15   :  { %p409_p9 = pnand %p408_p8, %p402_p5 }
  0x17   :  { %412 = shalt.err (!%p409_p9)
}
  0x18   :  { %31 = dma.hbm_to_vmem [thread:$0]  %s476_s1, 128, %s29_s17, [#allocation6]  }
  0x19   :  { %433 = dma.done.wait [#allocation3], 640  }
  0x1a   :  { %434 = vsyncadd [#allocation3], 4294966656 }
  0x1b   :  { %435 = dma.done.wait [#allocation6], 128  }
  0x1c   :  { %436 = vsyncadd [#allocation6], 4294967168  ;;  %v443_v0 = vmov 8   ;;  %vm51_vm0 = vcmask 64512   ;;  %v38_v1 = vld [vmem:[#allocation5] sm:$0xff]  ;;  %v39_v2 = vld [vmem:[#allocation2] sm:$0xff] }
  0x1d   :  { %368 = vset.pattern.permute.xlu0 %v443_v0  ;;  %v40_v3 = vld [vmem:[#allocation2 + $0x8] sm:$0xff]  ;;  %340 = vmatprep.subr.mxu0 %v38_v1  ;;  %v133_v4 = vld [vmem:[#allocation2 + $0x10] sm:$0xff]  ;;  %vm145_vm1 = vcmask 130048   ;;  %v134_v5 = vld [vmem:[#allocation2 + $0x18] sm:$0xff]  ;;  %v444_v6 = vmov 16   ;;  %v445_v15 = vmov 0.0  }
  0x1e   :  { %342 = vmatprep.mubr.msk.f32.mxu0 %vm51_vm0, %v39_v2  ;;  %341 = vmatpush3.msra.mxu0 %v38_v1  ;;  %vm446_vm2 = vmmov 0   ;;  %v227_v16 = vld [vmem:[#allocation2 + $0x20] sm:$0xff]  ;;  %s447_s0 = smov [#allocation7]  }
  0x1f   :  { %48 = vperm.xlu0 %368, %v40_v3   ;;  %343 = vmatmul.mubr.msk.f32.vlgmr.msra.gmra.mxu0 %vm51_vm0, %v40_v3  ;;  %s315_s1 = sshll.u32 %s447_s0, 4  ;;  %s316_s1 = int_to_ptr.vmem [resolvable:$true] %s315_s1 }
  0x20   :  { %349 = vmatprep.mubr.msk.f32.mxu1 %vm145_vm1, %v133_v4  ;;  %369 = vset.pattern.permute.xlu1 %v444_v6  ;;  %s413_s21 = scalar_lea.vmem %s316_s1, 128  ;;  %p418_p11 = scmp.lt.s32.totalorder %s316_s1, %s316_s1 }
  0x21   :  { %142 = vperm.xlu1 %369, %v134_v5   ;;  %352 = vmatprep.subr.mxu0 %v445_v15  ;;  %p414_p10 = scmp.ne.s32.totalorder %s316_s1, %s413_s21  ;;  %p419_p12 = scmp.lt.s32.totalorder %s413_s21, %s413_s21 }
  0x22   :  { %356 = vmatprep.mubr.msk.f32.mxu0 %vm446_vm2, %v445_v15 }
  0x23   :  { %43 = vperm.xlu0 %368, %v39_v2   ;;  %p420_p13 = por %p419_p12, %p418_p11 }
  0x25   :  { %137 = vperm.xlu1 %369, %v133_v4   ;;  %p421_p0 = pnand %p420_p13, %p414_p10 }
  0x27   :  { %370 = vset.pattern.permute.xlu0 %v444_v6 }
  0x28   :  { %230 = vperm.xlu0 %370, %v227_v16  }
  0x9a   :  { %v49_v7 = vpop.permute.xlu0 %48 }
  0x9c   :  { %v143_v17 = vpop.permute.xlu1 %142 }
  0x9e   :  { %v44_v10 = vpop.permute.xlu0 %43 }
  0xa0   :  { %v138_v20 = vpop.permute.xlu1 %137 }
  0xa3   :  { %v231_v25 = vpop.permute.xlu0 %230 }
  0xdf   :  { %v344_v8 = vpop.f32.mrf.mxu0 }
  0xe0   :  { %v128_v9 = vadd.f32 %v344_v8, %v49_v7 }
  0xe1   :  { %v122_v11 = vpop.f32.mrf.mxu0 }
  0xe2   :  { %v132_v12 = vmax.f32 %v128_v9, 0.0  ;;  %v123_v13 = vadd.f32 %v122_v11, %v44_v10 }
  0xe4   :  { %v131_v14 = vmax.f32 %v123_v13, 0.0  ;;  %345 = vmatprep.subr.mxu1 %v132_v12 }
  0xe5   :  { %346 = vmatpush3.msra.mxu1 %v132_v12 }
  0xe6   :  { %347 = vmatprep.subr.mxu1 %v131_v14 }
  0xe7   :  { %348 = vmatpush3.msra.mxu1 %v131_v14 }
  0xe8   :  { %350 = vmatmul.mubr.msk.f32.vlgmr.msra.gmra.mxu1 %vm145_vm1, %v134_v5 }
 0x1a8   :  { %v351_v18 = vpop.f32.mrf.mxu1 }
 0x1a9   :  { %v222_v19 = vadd.f32 %v351_v18, %v143_v17 }
 0x1aa   :  { %v216_v21 = vpop.f32.mrf.mxu1 }
 0x1ab   :  { %v226_v22 = vmax.f32 %v222_v19, 0.0  ;;  %v217_v23 = vadd.f32 %v216_v21, %v138_v20 }
 0x1ad   :  { %v225_v24 = vmax.f32 %v217_v23, 0.0  ;;  %353 = vmatpush3.msra.mxu0 %v226_v22 }
 0x1ae   :  { %354 = vmatprep.subr.mxu0 %v445_v15 }
 0x1af   :  { %355 = vmatpush3.msra.mxu0 %v225_v24 }
 0x1b0   :  { %357 = vmatmul.mubr.msk.f32.vlgmr.msra.gmra.mxu0 %vm145_vm1, %v227_v16 }
 0x270   :  { %v301_v26 = vpop.f32.mrf.mxu0 }
 0x271   :  { %v302_v27 = vadd.f32 %v301_v26, %v231_v25 }
 0x272   :  { %v358_v28 = vpop.f32.mrf.mxu0 }
 0x273   :  { %371 = vtanh.f32 %v302_v27 }
 0x280   :  { %v372_v29 = vpop.eup %371 }
 0x281   :  { %v306_v30 = vmul.f32 0.1, %v372_v29 }
 0x283   :  { %v307_v31 = vadd.f32 1.0, %v306_v30 }
 0x285   :  { %308 = vst [vmem:[#allocation7] sm:$0xff] %v307_v31 }
 0x286   :  { %424 = shalt.err (!%p421_p0)
}
 0x287   :  { %318 = dma.vmem_to_hbm [thread:$0]  %s316_s1, 128, %s477_s2, [#allocation4]  }
 0x288   :  { %437 = dma.done.wait [#allocation4], 128  }
 0x289   :  { %438 = vsyncadd [#allocation4], 4294967168 }
 0x28a   :  { %322 = vsyncpa [#allocation3], 1 }
 0x28b   :  { %323 = vsyncpa [#allocation6], 1 }
 0x28c   :  { %324 = vsyncpa [#allocation4], 1 }

</bundles_post_ra>
